<compile_context>
chip_gen: v5e
topology: v5e:2x2
jax: 0.10.0
libtpu: 0.0.40
codegen_flags: <defaults>
</compile_context>

<pallas_src>
import jax
import jax.numpy as jnp
from jax.experimental import pallas as pl
from jax.experimental.pallas import tpu as pltpu

TEMPERATURE = 0.1
INV_TEMPERATURE = 1.0 / TEMPERATURE   # multiply instead of divide in-kernel

# Finite "very negative" mask value. NOT -inf: -inf would give inf-inf = NaN
# in the streaming logsumexp update. Load-bearing; do not "simplify" to -inf.
_NEG_BIG = -1e30
_LANE = 128


def _round_up(x, m):
    return (x + m - 1) // m * m


def _make_kernel(inv_t, d_total, td, k_per_split, need_col_mask):
    def kernel(s_ref, l_ref, m_ref, lse_ref, num_ref, den_ref):
        k = pl.program_id(2)

        # Reset the per-sample accumulators at the first tile of each
        # (batch-block, split) pair; output blocks stay resident across k.
        @pl.when(k == 0)
        def _():
            m_ref[...] = jnp.full_like(m_ref, -jnp.inf)
            lse_ref[...] = jnp.zeros_like(lse_ref)
            num_ref[...] = jnp.zeros_like(num_ref)
            den_ref[...] = jnp.zeros_like(den_ref)

        s = s_ref[...].astype(jnp.float32) * inv_t      # (TB, TD)  scores / T
        lab = l_ref[...].astype(jnp.float32)            # (TB, TD)

        if need_col_mask:
            # Mask the ragged tail (and fully-out-of-range clamped duplicate
            # tiles) instead of padding the inputs in HBM.
            si = pl.program_id(1)
            col0 = (si * k_per_split + k) * td
            col = jax.lax.broadcasted_iota(jnp.int32, s.shape, 1) + col0
            valid = col < d_total
            s = jnp.where(valid, s, _NEG_BIG)
            lab = jnp.where(valid, lab, 0.0)

        sel = lab >= 0.01
        masked_lab = jnp.where(sel, lab, 0.0)

        # Per-sample (per-row) partial sums.
        num_ref[...] += jnp.sum(jnp.where(sel, lab * s, 0.0), axis=1, keepdims=True)
        den_ref[...] += jnp.sum(masked_lab, axis=1, keepdims=True)

        # Streaming (online) max-subtracted logsumexp of s/T per sample.
        m_prev = m_ref[...]
        m_new = jnp.maximum(m_prev, jnp.max(s, axis=1, keepdims=True))
        lse_ref[...] = (lse_ref[...] * jnp.exp(m_prev - m_new)
                        + jnp.sum(jnp.exp(s - m_new), axis=1, keepdims=True))
        m_ref[...] = m_new

    return kernel


def contrastive_loss(scores, labels, *, block_bytes=2 << 20, num_d_splits=None):
    """scores, labels: (B, C, H, W) (any trailing dims). Returns scalar loss."""
    assert scores.shape == labels.shape and scores.ndim >= 2
    B = int(scores.shape[0])
    D = 1
    for d in scores.shape[1:]:
        D *= int(d)

    s2 = scores.reshape(B, D)      # free reshape; no pad, no astype copy
    l2 = labels.reshape(B, D)

    s_item = jnp.dtype(scores.dtype).itemsize
    l_item = jnp.dtype(labels.dtype).itemsize
    # Sublane granularity: 8 for 32-bit, 16 for bf16, 32 for 8-bit inputs.
    sub = max(8, 32 // min(s_item, l_item))

    # Tile geometry: ~block_bytes per input per step, (8, 128)-legal.
    target_elems = max(block_bytes // max(s_item, l_item), sub * _LANE)
    td_desired = max(_LANE, (target_elems // sub) // _LANE * _LANE)
    td = D if D <= td_desired else td_desired              # full dim or 128-mult
    tb_desired = max(sub, (target_elems // td) // sub * sub)
    tb = B if B <= tb_desired else tb_desired              # full dim or 8-mult

    kt = pl.cdiv(D, td)            # real feature tiles per sample
    nb = pl.cdiv(B, tb)            # batch blocks

    # D-axis split: a second "parallel" grid unit so both v7x TensorCores get
    # work when B is tiny (single batch block). Harmless on 1-TC chips.
    if num_d_splits is None:
        S = 2 if (nb == 1 and kt >= 2) else 1
    else:
        S = max(1, min(int(num_d_splits), kt))
    K = pl.cdiv(kt, S)
    need_col_mask = (S * K * td) != D

    if S * K == kt:
        in_map = lambda bi, si, k: (bi, si * K + k)
    else:
        # Clamp fully-out-of-range duplicate tiles to the last real tile; the
        # in-kernel column mask zeroes their contribution.
        in_map = lambda bi, si, k: (bi, jnp.minimum(si * K + k, kt - 1))
    out_map = lambda bi, si, k: (si, bi, 0)

    out_part = jax.ShapeDtypeStruct((S, B, 1), jnp.float32)
    out_spec = pl.BlockSpec((pl.Squeezed(), tb, 1), out_map)

    kernel = _make_kernel(INV_TEMPERATURE, D, td, K, need_col_mask)

    m_p, lse_p, num_p, den_p = pl.pallas_call(
        kernel,
        out_shape=(out_part, out_part, out_part, out_part),
        grid_spec=pltpu.PrefetchScalarGridSpec(
            num_scalar_prefetch=0,
            grid=(nb, S, K),
            in_specs=[
                pl.BlockSpec((tb, td), in_map),
                pl.BlockSpec((tb, td), in_map),
            ],
            out_specs=(out_spec, out_spec, out_spec, out_spec),
        ),
        compiler_params=pltpu.CompilerParams(
            dimension_semantics=("parallel", "parallel", "arbitrary")),
        cost_estimate=pl.CostEstimate(
            flops=12 * B * D,
            transcendentals=B * D,
            bytes_accessed=B * D * (s_item + l_item) + 4 * S * B * 4),
    )(s2, l2)

    # Tiny XLA-side combine over the split partials (S*B floats each).
    m = m_p[:, :, 0]
    lse = lse_p[:, :, 0]
    num = num_p[:, :, 0]
    den = den_p[:, :, 0]
    gm = jnp.max(m, axis=0)                                        # (B,)
    log_denom = gm + jnp.log(jnp.sum(lse * jnp.exp(m - gm[None, :]), axis=0))
    den_tot = jnp.sum(den, axis=0)                                 # (B,)
    num_tot = jnp.sum(num, axis=0) - log_denom * den_tot           # per-sample numerator
    # NOTE: if no label >= 0.01 anywhere this is 0/0 = NaN, matching PyTorch.
    return -jnp.sum(num_tot) / jnp.sum(den_tot)


def _reference(scores, labels, tem=TEMPERATURE):
    # Pure-JAX mirror of the PyTorch forward (masked_select -> where, since
    # excluded elements contribute 0 to both sums).
    exp_scores = jnp.exp(scores / tem)
    denom = jnp.sum(exp_scores, axis=tuple(range(1, scores.ndim)), keepdims=True)
    mask = labels >= 0.01
    inner = jnp.log(exp_scores / denom)
    num = jnp.sum(jnp.where(mask, inner * labels, 0.0))
    den = jnp.sum(jnp.where(mask, labels, 0.0))
    return -num / den


if __name__ == "__main__":
    key = jax.random.PRNGKey(0)

    def run_case(case_key, shape, **kw):
        k1, k2 = jax.random.split(case_key)
        scores = jax.random.normal(k1, shape, dtype=jnp.float32)
        labels = jax.random.uniform(k2, shape, dtype=jnp.float32)
        loss = contrastive_loss(scores, labels, **kw)
        jax.block_until_ready(loss)
        ref = _reference(scores, labels)
        assert jnp.allclose(loss, ref, rtol=1e-4, atol=1e-4), (shape, kw, loss, ref)

    keys = jax.random.split(key, 4)
    # Primary shape implied by the module: single tile, no masking, no split.
    run_case(keys[0], (2, 4, 16, 16))
    # Multi D-tile + auto D-split (streaming logsumexp + split combine path).
    run_case(keys[1], (2, 8, 16, 16), block_bytes=4096)
    # Ragged feature dim + clamped duplicate tile (in-kernel column mask path).
    run_case(keys[2], (2, 3, 10, 10), block_bytes=4096)
    # Multiple batch blocks with a ragged final batch block (clipped writeback).
    run_case(keys[3], (10, 4, 8, 8), block_bytes=4096)

    print("KERNEL_OK")
</pallas_src>

<mosaic_0001>
module attributes {stable_mosaic.version = 11 : i64} {
  func.func @kernel(%arg0: i32, %arg1: i32, %arg2: i32, %arg3: memref<2x1024xf32, #tpu.memory_space<vmem>>, %arg4: memref<2x1024xf32, #tpu.memory_space<vmem>>, %arg5: memref<1x2x1xf32, #tpu.memory_space<vmem>>, %arg6: memref<1x2x1xf32, #tpu.memory_space<vmem>>, %arg7: memref<1x2x1xf32, #tpu.memory_space<vmem>>, %arg8: memref<1x2x1xf32, #tpu.memory_space<vmem>>) attributes {dimension_semantics = [#tpu.dimension_semantics<parallel>, #tpu.dimension_semantics<parallel>, #tpu.dimension_semantics<arbitrary>], iteration_bounds = array<i64: 1, 1, 1>, scalar_prefetch = 0 : i64, scratch_operands = 0 : i64, tpu.core_type = #tpu.core_type<tc>, window_params = [{transform_indices = @transform_0, window_bounds = array<i64: 2, 1024>}, {transform_indices = @transform_1, window_bounds = array<i64: 2, 1024>}, {transform_indices = @transform_2, window_bounds = array<i64: 1, 2, 1>}, {transform_indices = @transform_3, window_bounds = array<i64: 1, 2, 1>}, {transform_indices = @transform_4, window_bounds = array<i64: 1, 2, 1>}, {transform_indices = @transform_5, window_bounds = array<i64: 1, 2, 1>}]} {
    %c0_i32 = arith.constant 0 : i32
    %0 = arith.cmpi eq, %arg2, %c0_i32 : i32
    %1 = arith.extui %0 : i1 to i32
    %c0_i32_0 = arith.constant 0 : i32
    %2 = arith.cmpi ne, %1, %c0_i32_0 : i32
    scf.if %2 {
      %cst_35 = arith.constant 0xFF800000 : f32
      %52 = vector.broadcast %cst_35 : f32 to vector<2x1xf32>
      %c0_36 = arith.constant 0 : index
      %c0_37 = arith.constant 0 : index
      %c0_38 = arith.constant 0 : index
      %53 = vector.load %arg5[%c0_36, %c0_37, %c0_38] : memref<1x2x1xf32, #tpu.memory_space<vmem>>, vector<1x2x1xf32>
      %54 = vector.shape_cast %53 : vector<1x2x1xf32> to vector<2x1xf32>
      %55 = vector.shape_cast %52 : vector<2x1xf32> to vector<1x2x1xf32>
      tpu.vector_store %arg5[%c0_36, %c0_37, %c0_38], %55 {strides = array<i32>} : memref<1x2x1xf32, #tpu.memory_space<vmem>>, vector<1x2x1xf32>,
      %cst_39 = arith.constant 0.000000e+00 : f32
      %56 = vector.broadcast %cst_39 : f32 to vector<2x1xf32>
      %c0_40 = arith.constant 0 : index
      %c0_41 = arith.constant 0 : index
      %c0_42 = arith.constant 0 : index
      %57 = vector.load %arg6[%c0_40, %c0_41, %c0_42] : memref<1x2x1xf32, #tpu.memory_space<vmem>>, vector<1x2x1xf32>
      %58 = vector.shape_cast %57 : vector<1x2x1xf32> to vector<2x1xf32>
      %59 = vector.shape_cast %56 : vector<2x1xf32> to vector<1x2x1xf32>
      tpu.vector_store %arg6[%c0_40, %c0_41, %c0_42], %59 {strides = array<i32>} : memref<1x2x1xf32, #tpu.memory_space<vmem>>, vector<1x2x1xf32>,
      %cst_43 = arith.constant 0.000000e+00 : f32
      %60 = vector.broadcast %cst_43 : f32 to vector<2x1xf32>
      %c0_44 = arith.constant 0 : index
      %c0_45 = arith.constant 0 : index
      %c0_46 = arith.constant 0 : index
      %61 = vector.load %arg7[%c0_44, %c0_45, %c0_46] : memref<1x2x1xf32, #tpu.memory_space<vmem>>, vector<1x2x1xf32>
      %62 = vector.shape_cast %61 : vector<1x2x1xf32> to vector<2x1xf32>
      %63 = vector.shape_cast %60 : vector<2x1xf32> to vector<1x2x1xf32>
      tpu.vector_store %arg7[%c0_44, %c0_45, %c0_46], %63 {strides = array<i32>} : memref<1x2x1xf32, #tpu.memory_space<vmem>>, vector<1x2x1xf32>,
      %cst_47 = arith.constant 0.000000e+00 : f32
      %64 = vector.broadcast %cst_47 : f32 to vector<2x1xf32>
      %c0_48 = arith.constant 0 : index
      %c0_49 = arith.constant 0 : index
      %c0_50 = arith.constant 0 : index
      %65 = vector.load %arg8[%c0_48, %c0_49, %c0_50] : memref<1x2x1xf32, #tpu.memory_space<vmem>>, vector<1x2x1xf32>
      %66 = vector.shape_cast %65 : vector<1x2x1xf32> to vector<2x1xf32>
      %67 = vector.shape_cast %64 : vector<2x1xf32> to vector<1x2x1xf32>
      tpu.vector_store %arg8[%c0_48, %c0_49, %c0_50], %67 {strides = array<i32>} : memref<1x2x1xf32, #tpu.memory_space<vmem>>, vector<1x2x1xf32>,
    } else {
    }
    %c0 = arith.constant 0 : index
    %c0_1 = arith.constant 0 : index
    %3 = vector.load %arg3[%c0, %c0_1] : memref<2x1024xf32, #tpu.memory_space<vmem>>, vector<2x1024xf32>
    %cst = arith.constant 1.000000e+01 : f32
    %4 = vector.broadcast %cst : f32 to vector<2x1024xf32>
    %5 = arith.mulf %3, %4 : vector<2x1024xf32>
    %c0_2 = arith.constant 0 : index
    %c0_3 = arith.constant 0 : index
    %6 = vector.load %arg4[%c0_2, %c0_3] : memref<2x1024xf32, #tpu.memory_space<vmem>>, vector<2x1024xf32>
    %cst_4 = arith.constant 0.00999999977 : f32
    %7 = vector.broadcast %cst_4 : f32 to vector<2x1024xf32>
    %8 = arith.cmpf oge, %6, %7 : vector<2x1024xf32>
    %cst_5 = arith.constant 0.000000e+00 : f32
    %9 = vector.broadcast %cst_5 : f32 to vector<2x1024xf32>
    %10 = arith.select %8, %6, %9 : vector<2x1024xi1>, vector<2x1024xf32>
    %c0_6 = arith.constant 0 : index
    %c0_7 = arith.constant 0 : index
    %c0_8 = arith.constant 0 : index
    %11 = vector.load %arg7[%c0_6, %c0_7, %c0_8] : memref<1x2x1xf32, #tpu.memory_space<vmem>>, vector<1x2x1xf32>
    %12 = vector.shape_cast %11 : vector<1x2x1xf32> to vector<2x1xf32>
    %13 = arith.mulf %6, %5 : vector<2x1024xf32>
    %cst_9 = arith.constant 0.000000e+00 : f32
    %14 = vector.broadcast %cst_9 : f32 to vector<2x1024xf32>
    %15 = arith.select %8, %13, %14 : vector<2x1024xi1>, vector<2x1024xf32>
    %cst_10 = arith.constant dense<0.000000e+00> : vector<2xf32>
    %16 = vector.multi_reduction <add>, %15, %cst_10 [1] : vector<2x1024xf32> to vector<2xf32>
    %17 = vector.shape_cast %16 : vector<2xf32> to vector<2x1xf32>
    %18 = arith.addf %12, %17 : vector<2x1xf32>
    %c0_11 = arith.constant 0 : index
    %c0_12 = arith.constant 0 : index
    %c0_13 = arith.constant 0 : index
    %19 = vector.load %arg7[%c0_11, %c0_12, %c0_13] : memref<1x2x1xf32, #tpu.memory_space<vmem>>, vector<1x2x1xf32>
    %20 = vector.shape_cast %19 : vector<1x2x1xf32> to vector<2x1xf32>
    %21 = vector.shape_cast %18 : vector<2x1xf32> to vector<1x2x1xf32>
    tpu.vector_store %arg7[%c0_11, %c0_12, %c0_13], %21 {strides = array<i32>} : memref<1x2x1xf32, #tpu.memory_space<vmem>>, vector<1x2x1xf32>,
    %c0_14 = arith.constant 0 : index
    %c0_15 = arith.constant 0 : index
    %c0_16 = arith.constant 0 : index
    %22 = vector.load %arg8[%c0_14, %c0_15, %c0_16] : memref<1x2x1xf32, #tpu.memory_space<vmem>>, vector<1x2x1xf32>
    %23 = vector.shape_cast %22 : vector<1x2x1xf32> to vector<2x1xf32>
    %cst_17 = arith.constant dense<0.000000e+00> : vector<2xf32>
    %24 = vector.multi_reduction <add>, %10, %cst_17 [1] : vector<2x1024xf32> to vector<2xf32>
    %25 = vector.shape_cast %24 : vector<2xf32> to vector<2x1xf32>
    %26 = arith.addf %23, %25 : vector<2x1xf32>
    %c0_18 = arith.constant 0 : index
    %c0_19 = arith.constant 0 : index
    %c0_20 = arith.constant 0 : index
    %27 = vector.load %arg8[%c0_18, %c0_19, %c0_20] : memref<1x2x1xf32, #tpu.memory_space<vmem>>, vector<1x2x1xf32>
    %28 = vector.shape_cast %27 : vector<1x2x1xf32> to vector<2x1xf32>
    %29 = vector.shape_cast %26 : vector<2x1xf32> to vector<1x2x1xf32>
    tpu.vector_store %arg8[%c0_18, %c0_19, %c0_20], %29 {strides = array<i32>} : memref<1x2x1xf32, #tpu.memory_space<vmem>>, vector<1x2x1xf32>,
    %c0_21 = arith.constant 0 : index
    %c0_22 = arith.constant 0 : index
    %c0_23 = arith.constant 0 : index
    %30 = vector.load %arg5[%c0_21, %c0_22, %c0_23] : memref<1x2x1xf32, #tpu.memory_space<vmem>>, vector<1x2x1xf32>
    %31 = vector.shape_cast %30 : vector<1x2x1xf32> to vector<2x1xf32>
    %cst_24 = arith.constant dense<0xFF800000> : vector<2xf32>
    %32 = vector.multi_reduction <maximumf>, %5, %cst_24 [1] : vector<2x1024xf32> to vector<2xf32>
    %33 = vector.shape_cast %32 : vector<2xf32> to vector<2x1xf32>
    %34 = arith.maximumf %31, %33 : vector<2x1xf32>
    %c0_25 = arith.constant 0 : index
    %c0_26 = arith.constant 0 : index
    %c0_27 = arith.constant 0 : index
    %35 = vector.load %arg6[%c0_25, %c0_26, %c0_27] : memref<1x2x1xf32, #tpu.memory_space<vmem>>, vector<1x2x1xf32>
    %36 = vector.shape_cast %35 : vector<1x2x1xf32> to vector<2x1xf32>
    %37 = arith.subf %31, %34 : vector<2x1xf32>
    %38 = math.exp %37 : vector<2x1xf32>
    %39 = arith.mulf %36, %38 : vector<2x1xf32>
    %40 = vector.broadcast %34 : vector<2x1xf32> to vector<2x1024xf32>
    %41 = arith.subf %5, %40 : vector<2x1024xf32>
    %42 = math.exp %41 : vector<2x1024xf32>
    %cst_28 = arith.constant dense<0.000000e+00> : vector<2xf32>
    %43 = vector.multi_reduction <add>, %42, %cst_28 [1] : vector<2x1024xf32> to vector<2xf32>
    %44 = vector.shape_cast %43 : vector<2xf32> to vector<2x1xf32>
    %45 = arith.addf %39, %44 : vector<2x1xf32>
    %c0_29 = arith.constant 0 : index
    %c0_30 = arith.constant 0 : index
    %c0_31 = arith.constant 0 : index
    %46 = vector.load %arg6[%c0_29, %c0_30, %c0_31] : memref<1x2x1xf32, #tpu.memory_space<vmem>>, vector<1x2x1xf32>
    %47 = vector.shape_cast %46 : vector<1x2x1xf32> to vector<2x1xf32>
    %48 = vector.shape_cast %45 : vector<2x1xf32> to vector<1x2x1xf32>
    tpu.vector_store %arg6[%c0_29, %c0_30, %c0_31], %48 {strides = array<i32>} : memref<1x2x1xf32, #tpu.memory_space<vmem>>, vector<1x2x1xf32>,
    %c0_32 = arith.constant 0 : index
    %c0_33 = arith.constant 0 : index
    %c0_34 = arith.constant 0 : index
    %49 = vector.load %arg5[%c0_32, %c0_33, %c0_34] : memref<1x2x1xf32, #tpu.memory_space<vmem>>, vector<1x2x1xf32>
    %50 = vector.shape_cast %49 : vector<1x2x1xf32> to vector<2x1xf32>
    %51 = vector.shape_cast %34 : vector<2x1xf32> to vector<1x2x1xf32>
    tpu.vector_store %arg5[%c0_32, %c0_33, %c0_34], %51 {strides = array<i32>} : memref<1x2x1xf32, #tpu.memory_space<vmem>>, vector<1x2x1xf32>,
    return
  }
  func.func @transform_0(%arg0: i32, %arg1: i32, %arg2: i32) -> (i32, i32) {
    %c1_i32 = arith.constant 1 : i32
    %0 = arith.muli %arg1, %c1_i32 : i32
    %1 = arith.addi %0, %arg2 : i32
    %c0_i32 = arith.constant 0 : i32
    return %arg0, %1 : i32, i32
  }
  func.func @transform_1(%arg0: i32, %arg1: i32, %arg2: i32) -> (i32, i32) {
    %c1_i32 = arith.constant 1 : i32
    %0 = arith.muli %arg1, %c1_i32 : i32
    %1 = arith.addi %0, %arg2 : i32
    %c0_i32 = arith.constant 0 : i32
    return %arg0, %1 : i32, i32
  }
  func.func @transform_2(%arg0: i32, %arg1: i32, %arg2: i32) -> (i32, i32, i32) {
    %c0_i32 = arith.constant 0 : i32
    %c0_i32_0 = arith.constant 0 : i32
    return %arg1, %arg0, %c0_i32 : i32, i32, i32
  }
  func.func @transform_3(%arg0: i32, %arg1: i32, %arg2: i32) -> (i32, i32, i32) {
    %c0_i32 = arith.constant 0 : i32
    %c0_i32_0 = arith.constant 0 : i32
    return %arg1, %arg0, %c0_i32 : i32, i32, i32
  }
  func.func @transform_4(%arg0: i32, %arg1: i32, %arg2: i32) -> (i32, i32, i32) {
    %c0_i32 = arith.constant 0 : i32
    %c0_i32_0 = arith.constant 0 : i32
    return %arg1, %arg0, %c0_i32 : i32, i32, i32
  }
  func.func @transform_5(%arg0: i32, %arg1: i32, %arg2: i32) -> (i32, i32, i32) {
    %c0_i32 = arith.constant 0 : i32
    %c0_i32_0 = arith.constant 0 : i32
    return %arg1, %arg0, %c0_i32 : i32, i32, i32
  }
}

</mosaic_0001>

<bundles_post_ra>
// kernel: tpu_custom_call.1
= control target key start
LH: loop header
LB: loop body
LE: loop exit
PB: predicated region body
PF: predicated region fallthrough
CT: control target
= control target key end

     0   :  { %11 = vsyncpa [#allocation3], 0  ;;  %s504_s0 = inlined_call_operand.hbm [shape: f32[2,1024], index: 0, kind: input, shape index: {}]   ;;  %s505_s1 = inlined_call_operand.hbm [shape: f32[2,1024], index: 1, kind: input, shape index: {}]   ;;  %s506_s2 = inlined_call_operand.vmem [shape: f32[1,2,1], index: 2, kind: output, shape index: {0}]   ;;  %s507_s3 = inlined_call_operand.vmem [shape: f32[1,2,1], index: 3, kind: output, shape index: {1}]   ;;  %s508_s4 = inlined_call_operand.vmem [shape: f32[1,2,1], index: 4, kind: output, shape index: {2}]   ;;  %s509_s5 = inlined_call_operand.vmem [shape: f32[1,2,1], index: 5, kind: output, shape index: {3}]  }
   0x1   :  { %s22_s20 = sshll.u32 %s504_s0, 4  ;;  %s23_s20 = int_to_ptr.hbm [resolvable:$true] %s22_s20 }
   0x2   :  { %12 = vsyncpa [#allocation5], 0  ;;  %s346_s21 = smov [#allocation2]   ;;  %s37_s25 = sshll.u32 %s505_s1, 4  ;;  %s38_s25 = int_to_ptr.hbm [resolvable:$true] %s37_s25 }
   0x3   :  { %s24_s22 = sshll.u32 %s346_s21, 4  ;;  %s347_s26 = smov [#allocation4]   ;;  %s25_s22 = int_to_ptr.vmem [resolvable:$true] %s24_s22 }
   0x4   :  { %27 = dma.hbm_to_vmem [thread:$0]  %s23_s20, 256, %s25_s22, [#allocation3]  }
   0x5   :  { %s39_s27 = sshll.u32 %s347_s26, 4  ;;  %s40_s27 = int_to_ptr.vmem [resolvable:$true] %s39_s27 }
   0x6   :  { %42 = dma.hbm_to_vmem [thread:$0]  %s38_s25, 256, %s40_s27, [#allocation5]  }
   0x7   :  { %342 = dma.done.wait [#allocation3], 256  }
   0x8   :  { %343 = vsyncadd [#allocation3], 4294967040 }
   0x9   :  { %344 = dma.done.wait [#allocation5], 256  }
   0xa   :  { %345 = vsyncadd [#allocation5], 4294967040  ;;  %v64_v0 = vld [vmem:[#allocation2] sm:$0xff]  ;;  %v65_v1 = vld [vmem:[#allocation2 + $0x8] sm:$0xff]  ;;  %vm59_vm2 = vcmask 1024   ;;  %v348_v20 = vmov -inf  }
   0xb   :  { %v68_v2 = vld [vmem:[#allocation4] sm:$0xff]  ;;  %v388_v3 = vmul.f32 10.0, %v64_v0  ;;  %v390_v4 = vmul.f32 10.0, %v65_v1  ;;  %v69_v5 = vld [vmem:[#allocation4 + $0x8] sm:$0xff]  ;;  %60 = vst.msk [vmem:[%s506_s2] sm:$0x3] %vm59_vm2, %v348_v20 }
   0xc   :  { %vm70_vm0 = vcmp.ge.f32.partialorder %v68_v2, 0.01  ;;  %vm71_vm1 = vcmp.ge.f32.partialorder %v69_v5, 0.01  ;;  %vm100_vm3 = vcmask 1041408   ;;  %v349_v52 = vmov 0  }
   0xd   :  { %v75_v6 = vmul.f32 %v68_v2, %v388_v3  ;;  %v76_v7 = vmul.f32 %v69_v5, %v390_v4  ;;  %v72_v10 = vsel %vm70_vm0, %v68_v2, 0.0  ;;  %v73_v11 = vsel %vm71_vm1, %v69_v5, 0.0  ;;  %287 = vset.pattern.permute.xlu0 %v349_v52 }
   0xe   :  { %v350_v53 = vmov 0.0  }
   0xf   :  { %v77_v8 = vsel %vm70_vm0, %v75_v6, 0.0  ;;  %v78_v9 = vsel %vm71_vm1, %v76_v7, 0.0  ;;  %62 = vst.msk [vmem:[%s508_s4] sm:$0x3] %vm59_vm2, %v350_v53 }
  0x10   :  { %81 = vst [vmem:[#allocation1] ss:$4 sm:$0xff] %v77_v8 }
  0x11   :  { %83 = vst [vmem:[#allocation1 + $0x20] ss:$4 sm:$0xff] %v78_v9 }
  0x12   :  { %61 = vst.msk [vmem:[%s507_s3] sm:$0x3] %vm59_vm2, %v350_v53  ;;  %v435_v54 = vld [vmem:[%s506_s2] sm:$0x3] }
  0x13   :  { %63 = vst.msk [vmem:[%s509_s5] sm:$0x3] %vm59_vm2, %v350_v53 }
  0x17   :  { %v84_v12 = vld.sshfl [vmem:[#allocation1] sm:$0xff pattern:$0x73625140]  ;;  %v85_v13 = vld.sshfl [vmem:[#allocation1 + $0x8] sm:$0xff pattern:$0x73625140] }
  0x18   :  { %v86_v14 = vld.sshfl [vmem:[#allocation1 + $0x10] sm:$0xff pattern:$0x73625140]  ;;  %v87_v15 = vld.sshfl [vmem:[#allocation1 + $0x18] sm:$0xff pattern:$0x73625140] }
  0x19   :  { %v394_v16 = vld.sshfl [vmem:[#allocation1 + $0x20] sm:$0xff pattern:$0x73625140]  ;;  %v396_v17 = vld.sshfl [vmem:[#allocation1 + $0x28] sm:$0xff pattern:$0x73625140] }
  0x1a   :  { %v398_v18 = vld.sshfl [vmem:[#allocation1 + $0x30] sm:$0xff pattern:$0x73625140]  ;;  %v400_v19 = vld.sshfl [vmem:[#allocation1 + $0x38] sm:$0xff pattern:$0x73625140] }
  0x1b   :  { %124 = vst [vmem:[#allocation1] ss:$4 sm:$0xff] %v72_v10  ;;  %v101_v58 = vsel %vm100_vm3, %v84_v12, 0.0  ;;  %v102_v59 = vsel %vm100_vm3, %v85_v13, 0.0  ;;  %v104_v60 = vsel %vm100_vm3, %v86_v14, 0.0  ;;  %v106_v62 = vsel %vm100_vm3, %v87_v15, 0.0 }
  0x1c   :  { %126 = vst [vmem:[#allocation1 + $0x20] ss:$4 sm:$0xff] %v73_v11  ;;  %v103_v61 = vadd.f32 %v102_v59, %v101_v58  ;;  %v108_v6 = vsel %vm100_vm3, %v394_v16, 0.0  ;;  %v110_v10 = vsel %vm100_vm3, %v396_v17, 0.0  ;;  %v112_v14 = vsel %vm100_vm3, %v398_v18, 0.0 }
  0x1e   :  { %v105_v2 = vadd.f32 %v104_v60, %v103_v61  ;;  %v74_v61 = vld [vmem:[%s508_s4] sm:$0x3] }
  0x20   :  { %v107_v8 = vadd.f32 %v106_v62, %v105_v2 }
  0x22   :  { %v127_v21 = vld.sshfl [vmem:[#allocation1] sm:$0xff pattern:$0x73625140]  ;;  %v128_v22 = vld.sshfl [vmem:[#allocation1 + $0x8] sm:$0xff pattern:$0x73625140]  ;;  %v109_v12 = vadd.f32 %v108_v6, %v107_v8 }
  0x23   :  { %v129_v23 = vld.sshfl [vmem:[#allocation1 + $0x10] sm:$0xff pattern:$0x73625140]  ;;  %v130_v24 = vld.sshfl [vmem:[#allocation1 + $0x18] sm:$0xff pattern:$0x73625140] }
  0x24   :  { %v131_v25 = vld.sshfl [vmem:[#allocation1 + $0x20] sm:$0xff pattern:$0x73625140]  ;;  %v132_v26 = vld.sshfl [vmem:[#allocation1 + $0x28] sm:$0xff pattern:$0x73625140]  ;;  %v111_v20 = vadd.f32 %v110_v10, %v109_v12 }
  0x25   :  { %v406_v27 = vld.sshfl [vmem:[#allocation1 + $0x30] sm:$0xff pattern:$0x73625140]  ;;  %v408_v28 = vld.sshfl [vmem:[#allocation1 + $0x38] sm:$0xff pattern:$0x73625140] }
  0x26   :  { %165 = vst [vmem:[#allocation1] ss:$4 sm:$0xff] %v388_v3  ;;  %v143_v63 = vsel %vm100_vm3, %v127_v21, 0.0  ;;  %v144_v0 = vsel %vm100_vm3, %v128_v22, 0.0  ;;  %v146_v1 = vsel %vm100_vm3, %v129_v23, 0.0  ;;  %v148_v7 = vsel %vm100_vm3, %v130_v24, 0.0 }
  0x27   :  { %167 = vst [vmem:[#allocation1 + $0x20] ss:$4 sm:$0xff] %v390_v4  ;;  %v145_v5 = vadd.f32 %v144_v0, %v143_v63  ;;  %v150_v11 = vsel %vm100_vm3, %v131_v25, 0.0  ;;  %v152_v15 = vsel %vm100_vm3, %v132_v26, 0.0  ;;  %v351_v22 = vmov 269488144  }
  0x28   :  { %v212_v16 = vunpack.c.l.s4 %v351_v22  ;;  %v114_v23 = vsel %vm100_vm3, %v400_v19, 0.0  ;;  %v113_v24 = vadd.f32 %v112_v14, %v111_v20  ;;  %v154_v17 = vsel %vm100_vm3, %v406_v27, 0.0  ;;  %v121_v0 = vld [vmem:[%s509_s5] sm:$0x3] }
  0x29   :  { %v147_v9 = vadd.f32 %v146_v1, %v145_v5  ;;  %v156_v18 = vsel %vm100_vm3, %v408_v28, 0.0 }
  0x2a   :  { %v115_v25 = vadd.f32 %v114_v23, %v113_v24 }
  0x2b   :  { %v149_v13 = vadd.f32 %v148_v7, %v147_v9  ;;  %v202_v7 = vld [vmem:[%s507_s3] sm:$0x3] }
  0x2c   :  { %116 = vadd.xlane.f32.xlu1 %v115_v25 }
  0x2d   :  { %v168_v29 = vld.sshfl [vmem:[#allocation1] sm:$0xff pattern:$0x73625140]  ;;  %v169_v30 = vld.sshfl [vmem:[#allocation1 + $0x8] sm:$0xff pattern:$0x73625140]  ;;  %v151_v21 = vadd.f32 %v150_v11, %v149_v13 }
  0x2e   :  { %v170_v31 = vld.sshfl [vmem:[#allocation1 + $0x10] sm:$0xff pattern:$0x73625140]  ;;  %v171_v32 = vld.sshfl [vmem:[#allocation1 + $0x18] sm:$0xff pattern:$0x73625140] }
  0x2f   :  { %v172_v33 = vld.sshfl [vmem:[#allocation1 + $0x20] sm:$0xff pattern:$0x73625140]  ;;  %v173_v34 = vld.sshfl [vmem:[#allocation1 + $0x28] sm:$0xff pattern:$0x73625140] }
  0x30   :  { %v174_v35 = vld.sshfl [vmem:[#allocation1 + $0x30] sm:$0xff pattern:$0x73625140]  ;;  %v175_v36 = vld.sshfl [vmem:[#allocation1 + $0x38] sm:$0xff pattern:$0x73625140] }
  0x31   :  { %v184_v37 = vsel %vm100_vm3, %v168_v29, -inf  ;;  %v185_v38 = vsel %vm100_vm3, %v169_v30, -inf  ;;  %v186_v39 = vsel %vm100_vm3, %v170_v31, -inf  ;;  %v187_v40 = vsel %vm100_vm3, %v171_v32, -inf }
  0x32   :  { %v188_v41 = vsel %vm100_vm3, %v172_v33, -inf  ;;  %v190_v42 = vsel %vm100_vm3, %v173_v34, -inf  ;;  %v192_v43 = vsel %vm100_vm3, %v174_v35, -inf  ;;  %v194_v44 = vsel %vm100_vm3, %v175_v36, -inf }
  0x33   :  { %v189_v45 = vmax.f32 %v184_v37, %v188_v41  ;;  %v191_v46 = vmax.f32 %v185_v38, %v190_v42  ;;  %v193_v47 = vmax.f32 %v186_v39, %v192_v43  ;;  %v195_v48 = vmax.f32 %v187_v40, %v194_v44 }
  0x34   :  { %v153_v29 = vadd.f32 %v152_v15, %v151_v21  ;;  %v213_v30 = vunpack.c.0.s8 %v212_v16 }
  0x35   :  { %v196_v49 = vmax.f32 %v189_v45, %v191_v46  ;;  %v197_v50 = vmax.f32 %v193_v47, %v195_v48 }
  0x36   :  { %v155_v31 = vadd.f32 %v154_v17, %v153_v29 }
  0x37   :  { %v198_v51 = vmax.f32 %v196_v49, %v197_v50 }
  0x38   :  { %v157_v33 = vadd.f32 %v156_v18, %v155_v31 }
  0x39   :  { %199 = vmax.xlane.f32.xlu0 %v198_v51 }
  0x3a   :  { %158 = vadd.xlane.f32.xlu1 %v157_v33 }
  0x9f   :  { %v117_v62 = vpop.xlane.xlu1 %116 }
  0xa0   :  { %v118_v63 = vadd.f32 %v117_v62, %v74_v61 }
  0xa2   :  { %120 = vst.msk [vmem:[%s508_s4] sm:$0x3] %vm59_vm2, %v118_v63 }
  0xac   :  { %v200_v55 = vpop.xlane.xlu0 %199 }
  0xad   :  { %v438_v56 = vmax.f32 %v435_v54, %v200_v55  ;;  %v159_v1 = vpop.xlane.xlu1 %158 }
  0xae   :  { %v160_v2 = vadd.f32 %v159_v1, %v121_v0 }
  0xaf   :  { %v203_v57 = vsub.f32 %v435_v54, %v438_v56  ;;  %262 = vst.msk [vmem:[%s506_s2] sm:$0x3] %vm59_vm2, %v438_v56  ;;  %209 = vperm.xlu0 %287, %v438_v56  }
  0xb0   :  { %161 = vst.msk [vmem:[%s509_s5] sm:$0x3] %vm59_vm2, %v160_v2 }
  0xb1   :  { %v204_v5 = vmul.f32 1.442695, %v203_v57 }
 0x121   :  { %v210_v26 = vpop.permute.xlu0 %209 }
 0x122   :  { %v214_v32 = vperm.slane %v210_v26, %v213_v30 }
 0x124   :  { %v216_v34 = vsub.f32 %v388_v3, %v214_v32  ;;  %v217_v35 = vsub.f32 %v390_v4, %v214_v32 }
 0x126   :  { %v218_v19 = vmul.f32 1.442695, %v216_v34  ;;  %v220_v36 = vmul.f32 1.442695, %v217_v35 }
 0x128   :  { %288 = vpow2.f32 %v218_v19 }
 0x129   :  { %290 = vpow2.f32 %v220_v36 }
 0x12a   :  { %292 = vpow2.f32 %v204_v5 }
 0x12e   :  { %v289_v27 = vpop.eup %288 }
 0x12f   :  { %v291_v37 = vpop.eup %290  ;;  %224 = vst [vmem:[#allocation1] ss:$4 sm:$0xff] %v289_v27 }
 0x130   :  { %226 = vst [vmem:[#allocation1 + $0x20] ss:$4 sm:$0xff] %v291_v37  ;;  %v293_v6 = vpop.eup %292 }
 0x131   :  { %v206_v8 = vmul.f32 %v293_v6, %v202_v7 }
 0x136   :  { %v227_v38 = vld.sshfl [vmem:[#allocation1] sm:$0xff pattern:$0x73625140]  ;;  %v228_v39 = vld.sshfl [vmem:[#allocation1 + $0x8] sm:$0xff pattern:$0x73625140] }
 0x137   :  { %v229_v40 = vld.sshfl [vmem:[#allocation1 + $0x10] sm:$0xff pattern:$0x73625140]  ;;  %v243_v28 = vsel %vm100_vm3, %v227_v38, 0.0  ;;  %v244_v41 = vsel %vm100_vm3, %v228_v39, 0.0 }
 0x138   :  { %v230_v42 = vld.sshfl [vmem:[#allocation1 + $0x18] sm:$0xff pattern:$0x73625140]  ;;  %v245_v3 = vadd.f32 %v244_v41, %v243_v28  ;;  %v246_v4 = vsel %vm100_vm3, %v229_v40, 0.0 }
 0x139   :  { %v231_v43 = vld.sshfl [vmem:[#allocation1 + $0x20] sm:$0xff pattern:$0x73625140]  ;;  %v248_v45 = vsel %vm100_vm3, %v230_v42, 0.0 }
 0x13a   :  { %v247_v44 = vadd.f32 %v246_v4, %v245_v3  ;;  %v232_v46 = vld.sshfl [vmem:[#allocation1 + $0x28] sm:$0xff pattern:$0x73625140]  ;;  %v250_v48 = vsel %vm100_vm3, %v231_v43, 0.0 }
 0x13b   :  { %v233_v49 = vld.sshfl [vmem:[#allocation1 + $0x30] sm:$0xff pattern:$0x73625140]  ;;  %v252_v51 = vsel %vm100_vm3, %v232_v46, 0.0 }
 0x13c   :  { %v249_v47 = vadd.f32 %v248_v45, %v247_v44  ;;  %v234_v52 = vld.sshfl [vmem:[#allocation1 + $0x38] sm:$0xff pattern:$0x73625140]  ;;  %v254_v55 = vsel %vm100_vm3, %v233_v49, 0.0 }
 0x13d   :  { %v256_v59 = vsel %vm100_vm3, %v234_v52, 0.0 }
 0x13e   :  { %v251_v50 = vadd.f32 %v250_v48, %v249_v47 }
 0x140   :  { %v253_v53 = vadd.f32 %v252_v51, %v251_v50 }
 0x142   :  { %v255_v58 = vadd.f32 %v254_v55, %v253_v53 }
 0x144   :  { %v257_v60 = vadd.f32 %v256_v59, %v255_v58 }
 0x146   :  { %258 = vadd.xlane.f32.xlu2 %v257_v60 }
 0x1b9   :  { %v259_v9 = vpop.xlane.xlu2 %258 }
 0x1ba   :  { %v260_v10 = vadd.f32 %v259_v9, %v206_v8 }
 0x1bc   :  { %261 = vst.msk [vmem:[%s507_s3] sm:$0x3] %vm59_vm2, %v260_v10 }
 0x1bd   :  { %279 = vsyncpa [#allocation3], 1 }
 0x1be   :  { %280 = vsyncpa [#allocation5], 1 }

</bundles_post_ra>
